<compile_context>
chip_gen: v7x
topology: tpu7x:2x2x1
jax: 0.10.0
libtpu: 0.0.40
codegen_flags: <defaults>
</compile_context>

<pallas_src>
import functools

import jax
import jax.numpy as jnp
from jax import lax
from jax.experimental import pallas as pl
from jax.experimental.pallas import tpu as pltpu

_EPS = 1e-8  # F.cosine_similarity default eps


def _contrastive_loss_kernel(v_ref, u_ref, u_diag_ref, out_ref, denom_acc,
                             *, temperature: float):
    j = pl.program_id(1)
    nj = pl.num_programs(1)

    inv_t = jnp.float32(1.0 / temperature)
    inv_eps = jnp.float32(1.0 / _EPS)

    v = v_ref[...]                                   # (TM, D), native dtype for MXU
    u = u_ref[...]                                   # (TN, D)
    v_f32 = v.astype(jnp.float32)
    u_f32 = u.astype(jnp.float32)

    @pl.when(j == 0)
    def _():
        denom_acc[...] = jnp.zeros_like(denom_acc)

    # Pairwise dot products on the MXU, contracting the last dim of both
    # operands directly (no materialized transpose of u).
    dots = lax.dot_general(
        v, u, dimension_numbers=(((1,), (1,)), ((), ())),
        preferred_element_type=jnp.float32)          # (TM, TN) f32

    # Row inverse norms: O(TM) rsqrt on the EUP, sublane layout (TM, 1).
    v_sq = jnp.sum(v_f32 * v_f32, axis=-1, keepdims=True)        # (TM, 1)
    inv_v = lax.rsqrt(v_sq)                                       # (TM, 1)

    # Column squared norms produced directly in lane layout (1, TN) via a
    # ones-row matmul (avoids a (TN,1)->(1,TN) transpose in the hot loop).
    ones_row = jnp.ones((1, u_f32.shape[1]), jnp.float32)
    u_sq_row = lax.dot_general(
        ones_row, u_f32 * u_f32, dimension_numbers=(((1,), (1,)), ((), ())),
        preferred_element_type=jnp.float32)                       # (1, TN)
    inv_u_row = lax.rsqrt(u_sq_row)                               # (1, TN)

    # scale = 1 / max(||v_i||*||u_j||, eps) with 1/T folded in.
    # For non-negative norms: 1/max(p, eps) == min(1/p, 1/eps) (IEEE inf handles p==0).
    scale = jnp.minimum((inv_v * inv_t) * inv_u_row, inv_eps * inv_t)  # (TM, TN)

    # Denominator contribution of this u tile.  (exp matches the torch
    # reference; no max-subtraction, see TODO below.)
    exp_scaled = jnp.exp(dots * scale)                            # (TM, TN)
    denom_acc[...] += jnp.sum(exp_scaled, axis=-1, keepdims=True)  # (TM, 1)
    # TODO(synk): add an online log-sum-exp (per-row max) if small temperatures /
    # large similarity scales ever overflow f32 -- the torch reference does not.

    @pl.when(j == nj - 1)
    def _():
        # Matched-pair (diagonal) cosine similarity: O(TM*D) elementwise work,
        # independent of the pairwise tile (replaces the iota-mask diagonal).
        ud_f32 = u_diag_ref[...].astype(jnp.float32)              # (TM, D)
        diag_dot = jnp.sum(v_f32 * ud_f32, axis=-1, keepdims=True)  # (TM, 1)
        ud_sq = jnp.sum(ud_f32 * ud_f32, axis=-1, keepdims=True)
        inv_ud = lax.rsqrt(ud_sq)
        diag_scale = jnp.minimum(inv_v * inv_ud, inv_eps)         # product clamp
        diag_scaled = diag_dot * diag_scale * inv_t               # (TM, 1)

        # loss = -log(exp(diag)/denom) = log(denom) - diag   (one log, no exp/div)
        loss = jnp.log(denom_acc[...]) - diag_scaled              # (TM, 1)
        out_ref[...] = loss.reshape(1, -1).astype(out_ref.dtype)  # lane-dense (1, TM)


def _pick_row_tile(b: int, preferred: int = 256) -> int:
    """Row tile: must be a multiple of 128 (lane-dense (1, TM) output) or == B."""
    if b <= preferred:
        return b
    for t in range(preferred, 127, -128):
        if b % t == 0:
            return t
    return b  # fallback: single row tile


def _pick_col_tile(b: int, preferred: int = 512) -> int:
    """Column (reduction) tile: multiple of 8 sublanes or == B.
    NOTE: on v7x (64 MiB VMEM) prefer halving this vs the v5e/v6e setting."""
    if b <= preferred:
        return b
    for t in range(preferred, 7, -8):
        if b % t == 0:
            return t
    return b  # fallback: whole u per step


def contrastive_loss(v: jax.Array, u: jax.Array, temperature: float = 1.0,
                     *, block_m: int | None = None,
                     block_n: int | None = None) -> jax.Array:
    """Pallas TPU implementation of ContrastiveLoss.forward. v, u: (B, D) -> (B,)."""
    assert v.shape == u.shape and v.ndim == 2
    B, D = v.shape

    tm = block_m or _pick_row_tile(B)
    tn = block_n or _pick_col_tile(B)
    assert B % tm == 0 and B % tn == 0
    grid = (B // tm, B // tn)
    # TODO(synk): chunk D as a third (arbitrary) grid axis if D is huge enough
    # that a (tile, D) slab no longer fits comfortably in VMEM.

    kernel = functools.partial(_contrastive_loss_kernel, temperature=temperature)
    out = pl.pallas_call(
        kernel,
        out_shape=jax.ShapeDtypeStruct((1, B), jnp.float32),
        grid_spec=pltpu.PrefetchScalarGridSpec(
            num_scalar_prefetch=0,
            grid=grid,
            in_specs=[
                pl.BlockSpec((tm, D), lambda i, j: (i, 0)),   # v row tile
                pl.BlockSpec((tn, D), lambda i, j: (j, 0)),   # u column (reduction) tile
                pl.BlockSpec((tm, D), lambda i, j: (i, 0)),   # u matched (diagonal) tile
            ],
            out_specs=pl.BlockSpec((1, tm), lambda i, j: (0, i)),
            scratch_shapes=[pltpu.VMEM((tm, 1), jnp.float32)],   # denominator accumulator
        ),
        compiler_params=pltpu.CompilerParams(
            dimension_semantics=("parallel", "arbitrary"),
            vmem_limit_bytes=48 * 1024 * 1024,
        ),
    )(v, u, u)
    return out.reshape(B)


def _reference_contrastive_loss(v, u, temperature=1.0):
    """Pure-JAX reference mirroring the PyTorch module (cosine-sim matrix form)."""
    v = v.astype(jnp.float32)
    u = u.astype(jnp.float32)
    v_norm = jnp.sqrt(jnp.sum(v * v, axis=-1, keepdims=True))
    u_norm = jnp.sqrt(jnp.sum(u * u, axis=-1, keepdims=True))
    pair = (v @ u.T) / jnp.maximum(v_norm * u_norm.T, _EPS) / temperature
    # F.cosine_similarity(v, u) (the numerator) is a row-wise elementwise dot.
    diag = (jnp.sum(v * u, axis=-1)
            / jnp.maximum((v_norm * u_norm)[:, 0], _EPS) / temperature)
    denominator = jnp.sum(jnp.exp(pair), axis=-1)
    return jnp.log(denominator) - diag   # == -log(exp(diag) / denominator)


if __name__ == "__main__":
    key = jax.random.PRNGKey(0)
    k_v, k_u = jax.random.split(key)
    B, D = 8, 32  # small (batch, hidden) embeddings consistent with the module
    v = jax.random.normal(k_v, (B, D), dtype=jnp.float32)
    u = jax.random.normal(k_u, (B, D), dtype=jnp.float32)

    ok = True
    for temperature in (1.0, 0.5):
        loss = jax.block_until_ready(contrastive_loss(v, u, temperature))
        ref = _reference_contrastive_loss(v, u, temperature)
        assert loss.shape == (B,)
        ok &= bool(jnp.allclose(loss, ref, rtol=1e-5, atol=1e-5))
        assert ok, (temperature, loss, ref)

    print("KERNEL_OK")
</pallas_src>

<mosaic_0001>
module attributes {stable_mosaic.version = 11 : i64} {
  func.func @_contrastive_loss_kernel(%arg0: i32, %arg1: i32, %arg2: memref<8x32xf32, #tpu.memory_space<vmem>>, %arg3: memref<8x32xf32, #tpu.memory_space<vmem>>, %arg4: memref<8x32xf32, #tpu.memory_space<vmem>>, %arg5: memref<1x8xf32, #tpu.memory_space<vmem>>, %arg6: memref<8x1xf32, #tpu.memory_space<vmem>>) attributes {dimension_semantics = [#tpu.dimension_semantics<parallel>, #tpu.dimension_semantics<arbitrary>], iteration_bounds = array<i64: 1, 1>, scalar_prefetch = 0 : i64, scratch_operands = 1 : i64, tpu.core_type = #tpu.core_type<tc>, window_params = [{transform_indices = @transform_0, window_bounds = array<i64: 8, 32>}, {transform_indices = @transform_1, window_bounds = array<i64: 8, 32>}, {transform_indices = @transform_2, window_bounds = array<i64: 8, 32>}, {transform_indices = @transform_3, window_bounds = array<i64: 1, 8>}]} {
    %c0 = arith.constant 0 : index
    %c0_0 = arith.constant 0 : index
    %0 = vector.load %arg2[%c0, %c0_0] : memref<8x32xf32, #tpu.memory_space<vmem>>, vector<8x32xf32>
    %c0_1 = arith.constant 0 : index
    %c0_2 = arith.constant 0 : index
    %1 = vector.load %arg3[%c0_1, %c0_2] : memref<8x32xf32, #tpu.memory_space<vmem>>, vector<8x32xf32>
    %c0_i32 = arith.constant 0 : i32
    %2 = arith.cmpi eq, %arg1, %c0_i32 : i32
    %3 = arith.extui %2 : i1 to i32
    %c0_i32_3 = arith.constant 0 : i32
    %4 = arith.cmpi ne, %3, %c0_i32_3 : i32
    scf.if %4 {
      %cst_19 = arith.constant 0.000000e+00 : f32
      %32 = vector.broadcast %cst_19 : f32 to vector<8x1xf32>
      %c0_20 = arith.constant 0 : index
      %c0_21 = arith.constant 0 : index
      %33 = vector.load %arg6[%c0_20, %c0_21] : memref<8x1xf32, #tpu.memory_space<vmem>>, vector<8x1xf32>
      tpu.vector_store %arg6[%c0_20, %c0_21], %32 {strides = array<i32>} : memref<8x1xf32, #tpu.memory_space<vmem>>, vector<8x1xf32>,
    } else {
    }
    %cst = arith.constant dense<0.000000e+00> : vector<8x8xf32>
    %5 = tpu.matmul %0, %1, %cst {dimension_numbers = #tpu.dot_dimension_numbers<[1], [1], [0], [0], [0, 0, 1, 0], [], []>} : vector<8x32xf32>, vector<8x32xf32>, vector<8x8xf32> -> vector<8x8xf32>
    %6 = arith.mulf %0, %0 : vector<8x32xf32>
    %cst_4 = arith.constant dense<0.000000e+00> : vector<8xf32>
    %7 = vector.multi_reduction <add>, %6, %cst_4 [1] : vector<8x32xf32> to vector<8xf32>
    %8 = vector.shape_cast %7 : vector<8xf32> to vector<8x1xf32>
    %9 = math.rsqrt %8 : vector<8x1xf32>
    %cst_5 = arith.constant 1.000000e+00 : f32
    %10 = vector.broadcast %cst_5 : f32 to vector<1x32xf32>
    %11 = arith.mulf %1, %1 : vector<8x32xf32>
    %cst_6 = arith.constant dense<0.000000e+00> : vector<1x8xf32>
    %12 = tpu.matmul %10, %11, %cst_6 {dimension_numbers = #tpu.dot_dimension_numbers<[1], [1], [0], [0], [0, 0, 1, 0], [], []>} : vector<1x32xf32>, vector<8x32xf32>, vector<1x8xf32> -> vector<1x8xf32>
    %13 = math.rsqrt %12 : vector<1x8xf32>
    %cst_7 = arith.constant 1.000000e+00 : f32
    %14 = vector.broadcast %cst_7 : f32 to vector<8x1xf32>
    %15 = arith.mulf %9, %14 : vector<8x1xf32>
    %16 = vector.broadcast %15 : vector<8x1xf32> to vector<8x8xf32>
    %17 = vector.broadcast %13 : vector<1x8xf32> to vector<8x8xf32>
    %18 = arith.mulf %16, %17 : vector<8x8xf32>
    %cst_8 = arith.constant 1.000000e+08 : f32
    %cst_9 = arith.constant 1.000000e+00 : f32
    %19 = arith.mulf %cst_8, %cst_9 : f32
    %20 = vector.broadcast %19 : f32 to vector<8x8xf32>
    %21 = arith.minimumf %18, %20 : vector<8x8xf32>
    %22 = arith.mulf %5, %21 : vector<8x8xf32>
    %23 = math.exp %22 : vector<8x8xf32>
    %c0_10 = arith.constant 0 : index
    %c0_11 = arith.constant 0 : index
    %24 = vector.load %arg6[%c0_10, %c0_11] : memref<8x1xf32, #tpu.memory_space<vmem>>, vector<8x1xf32>
    %cst_12 = arith.constant dense<0.000000e+00> : vector<8xf32>
    %25 = vector.multi_reduction <add>, %23, %cst_12 [1] : vector<8x8xf32> to vector<8xf32>
    %26 = vector.shape_cast %25 : vector<8xf32> to vector<8x1xf32>
    %27 = arith.addf %24, %26 : vector<8x1xf32>
    %c0_13 = arith.constant 0 : index
    %c0_14 = arith.constant 0 : index
    %28 = vector.load %arg6[%c0_13, %c0_14] : memref<8x1xf32, #tpu.memory_space<vmem>>, vector<8x1xf32>
    tpu.vector_store %arg6[%c0_13, %c0_14], %27 {strides = array<i32>} : memref<8x1xf32, #tpu.memory_space<vmem>>, vector<8x1xf32>,
    %c0_i32_15 = arith.constant 0 : i32
    %29 = arith.cmpi eq, %arg1, %c0_i32_15 : i32
    %30 = arith.extui %29 : i1 to i32
    %cst_16 = arith.constant 1.000000e+08 : f32
    %cst_17 = arith.constant 1.000000e+00 : f32
    %c0_i32_18 = arith.constant 0 : i32
    %31 = arith.cmpi ne, %30, %c0_i32_18 : i32
    scf.if %31 {
      %c0_19 = arith.constant 0 : index
      %c0_20 = arith.constant 0 : index
      %32 = vector.load %arg4[%c0_19, %c0_20] : memref<8x32xf32, #tpu.memory_space<vmem>>, vector<8x32xf32>
      %33 = arith.mulf %0, %32 : vector<8x32xf32>
      %cst_21 = arith.constant dense<0.000000e+00> : vector<8xf32>
      %34 = vector.multi_reduction <add>, %33, %cst_21 [1] : vector<8x32xf32> to vector<8xf32>
      %35 = vector.shape_cast %34 : vector<8xf32> to vector<8x1xf32>
      %36 = arith.mulf %32, %32 : vector<8x32xf32>
      %cst_22 = arith.constant dense<0.000000e+00> : vector<8xf32>
      %37 = vector.multi_reduction <add>, %36, %cst_22 [1] : vector<8x32xf32> to vector<8xf32>
      %38 = vector.shape_cast %37 : vector<8xf32> to vector<8x1xf32>
      %39 = math.rsqrt %38 : vector<8x1xf32>
      %40 = arith.mulf %9, %39 : vector<8x1xf32>
      %41 = vector.broadcast %cst_16 : f32 to vector<8x1xf32>
      %42 = arith.minimumf %40, %41 : vector<8x1xf32>
      %43 = arith.mulf %35, %42 : vector<8x1xf32>
      %44 = vector.broadcast %cst_17 : f32 to vector<8x1xf32>
      %45 = arith.mulf %43, %44 : vector<8x1xf32>
      %c0_23 = arith.constant 0 : index
      %c0_24 = arith.constant 0 : index
      %46 = vector.load %arg6[%c0_23, %c0_24] : memref<8x1xf32, #tpu.memory_space<vmem>>, vector<8x1xf32>
      %47 = math.log %46 : vector<8x1xf32>
      %48 = arith.subf %47, %45 : vector<8x1xf32>
      %49 = vector.shape_cast %48 : vector<8x1xf32> to vector<1x8xf32>
      %c0_25 = arith.constant 0 : index
      %c0_26 = arith.constant 0 : index
      %50 = vector.load %arg5[%c0_25, %c0_26] : memref<1x8xf32, #tpu.memory_space<vmem>>, vector<1x8xf32>
      tpu.vector_store %arg5[%c0_25, %c0_26], %49 {strides = array<i32>} : memref<1x8xf32, #tpu.memory_space<vmem>>, vector<1x8xf32>,
    } else {
    }
    return
  }
  func.func @transform_0(%arg0: i32, %arg1: i32) -> (i32, i32) {
    %c0_i32 = arith.constant 0 : i32
    %c0_i32_0 = arith.constant 0 : i32
    return %arg0, %c0_i32 : i32, i32
  }
  func.func @transform_1(%arg0: i32, %arg1: i32) -> (i32, i32) {
    %c0_i32 = arith.constant 0 : i32
    %c0_i32_0 = arith.constant 0 : i32
    return %arg1, %c0_i32 : i32, i32
  }
  func.func @transform_2(%arg0: i32, %arg1: i32) -> (i32, i32) {
    %c0_i32 = arith.constant 0 : i32
    %c0_i32_0 = arith.constant 0 : i32
    return %arg0, %c0_i32 : i32, i32
  }
  func.func @transform_3(%arg0: i32, %arg1: i32) -> (i32, i32) {
    %c0_i32 = arith.constant 0 : i32
    %c0_i32_0 = arith.constant 0 : i32
    return %c0_i32, %arg0 : i32, i32
  }
}

</mosaic_0001>

<bundles_post_ra>
// kernel: tpu_custom_call.1
= control target key start
LH: loop header
LB: loop body
LE: loop exit
PB: predicated region body
PF: predicated region fallthrough
CT: control target
= control target key end

     0   :  { %8 = vsyncpa [#allocation4], 0  ;;  %s500_s0 = inlined_call_operand.hbm [shape: f32[8,32], index: 0, kind: input, shape index: {}]   ;;  %s501_s1 = inlined_call_operand.hbm [shape: f32[8,32], index: 1, kind: input, shape index: {}]   ;;  %s502_s2 = inlined_call_operand.hbm [shape: f32[8,32], index: 2, kind: input, shape index: {}]   ;;  %s503_s3 = inlined_call_operand.hbm [shape: f32[1,8], index: 3, kind: output, shape index: {}]  }
   0x1   :  { %9 = vsyncpa [#allocation7], 0 }
   0x2   :  { %10 = vsyncpa [#allocation5], 0  ;;  %s415_s12 = smov [#allocation6]   ;;  %s416_s14 = smov [#allocation3]  }
   0x3   :  { %s27_s13 = sshll.u32 %s415_s12, 4  ;;  %s17_s15 = sshll.u32 %s416_s14, 4  ;;  %s28_s13 = int_to_ptr.vmem [resolvable:$true] %s27_s13  ;;  %s18_s15 = int_to_ptr.vmem [resolvable:$true] %s17_s15 }
   0x4   :  { %s321_s18 = scalar_lea.hbm %s501_s1, 128 }
   0x5   :  { %p322_p0 = scmp.ne.s32.totalorder %s501_s1, %s321_s18  ;;  %p325_p1 = scmp.lt.u32.totalorder %s321_s18, %s501_s1 }
   0x7   :  { %p327_p2 = pnand %p325_p1, %p322_p0 }
   0x9   :  { %330 = shalt.err (!%p327_p2)
}
   0xa   :  { %s331_s23 = scalar_lea.vmem %s28_s13, 128  ;;  %p336_p4 = scmp.lt.s32.totalorder %s28_s13, %s28_s13 }
   0xb   :  { %p332_p3 = scmp.ne.s32.totalorder %s28_s13, %s331_s23  ;;  %p337_p5 = scmp.lt.s32.totalorder %s331_s23, %s331_s23 }
   0xd   :  { %p338_p6 = por %p337_p5, %p336_p4 }
   0xf   :  { %p339_p7 = pnand %p338_p6, %p332_p3 }
  0x11   :  { %342 = shalt.err (!%p339_p7)
}
  0x12   :  { %30 = dma.hbm_to_vmem [thread:$0]  %s501_s1, 128, %s28_s13, [#allocation7]  }
  0x13   :  { %s343_s28 = scalar_lea.hbm %s500_s0, 128 }
  0x14   :  { %p344_p8 = scmp.ne.s32.totalorder %s500_s0, %s343_s28  ;;  %p347_p9 = scmp.lt.u32.totalorder %s343_s28, %s500_s0 }
  0x16   :  { %p349_p10 = pnand %p347_p9, %p344_p8 }
  0x18   :  { %352 = shalt.err (!%p349_p10)
}
  0x19   :  { %s353_s6 = scalar_lea.vmem %s18_s15, 128  ;;  %p358_p12 = scmp.lt.s32.totalorder %s18_s15, %s18_s15 }
  0x1a   :  { %p354_p11 = scmp.ne.s32.totalorder %s18_s15, %s353_s6  ;;  %p359_p13 = scmp.lt.s32.totalorder %s353_s6, %s353_s6 }
  0x1c   :  { %p360_p0 = por %p359_p13, %p358_p12 }
  0x1e   :  { %p361_p1 = pnand %p360_p0, %p354_p11 }
  0x20   :  { %364 = shalt.err (!%p361_p1)
}
  0x21   :  { %20 = dma.hbm_to_vmem [thread:$0]  %s500_s0, 128, %s18_s15, [#allocation4]  }
  0x22   :  { %s417_s8 = smov [#allocation8]   ;;  %s365_s12 = scalar_lea.hbm %s502_s2, 128 }
  0x23   :  { %s37_s9 = sshll.u32 %s417_s8, 4  ;;  %p366_p2 = scmp.ne.s32.totalorder %s502_s2, %s365_s12  ;;  %s38_s9 = int_to_ptr.vmem [resolvable:$true] %s37_s9 }
  0x24   :  { %p369_p3 = scmp.lt.u32.totalorder %s365_s12, %s502_s2 }
  0x26   :  { %p371_p4 = pnand %p369_p3, %p366_p2 }
  0x28   :  { %374 = shalt.err (!%p371_p4)
}
  0x29   :  { %s375_s18 = scalar_lea.vmem %s38_s9, 128  ;;  %p380_p6 = scmp.lt.s32.totalorder %s38_s9, %s38_s9 }
  0x2a   :  { %p376_p5 = scmp.ne.s32.totalorder %s38_s9, %s375_s18  ;;  %p381_p7 = scmp.lt.s32.totalorder %s375_s18, %s375_s18 }
  0x2c   :  { %p382_p8 = por %p381_p7, %p380_p6 }
  0x2e   :  { %p383_p9 = pnand %p382_p8, %p376_p5 }
  0x30   :  { %386 = shalt.err (!%p383_p9)
}
  0x31   :  { %40 = dma.hbm_to_vmem [thread:$0]  %s502_s2, 128, %s38_s9, [#allocation7]  }
  0x32   :  { %409 = dma.done.wait [#allocation4], 128  }
  0x33   :  { %410 = vsyncadd [#allocation4], 4294967168 }
  0x34   :  { %411 = dma.done.wait [#allocation7], 256  }
  0x35   :  { %412 = vsyncadd [#allocation7], 4294967040  ;;  %vm56_vm0 = vcmask 7168   ;;  %v418_v0 = vmov 0.0   ;;  %vm419_vm1 = vmmov 0   ;;  %v51_v1 = vld [vmem:[#allocation6] sm:$0xff]  ;;  %v218_v16 = vlaneseq }
  0x36   :  { %57 = vst.msk [vmem:[#allocation2] sm:$0xff] %vm56_vm0, %v418_v0  ;;  %297 = vmatprep.subr.mxu1 %v418_v0  ;;  %299 = vmatprep.mubr.msk.f32.mxu1 %vm419_vm1, %v418_v0  ;;  %vm58_vm2 = vcmask 261120   ;;  %v50_v2 = vld [vmem:[#allocation3] sm:$0xff]  ;;  %v238_v3 = vld [vmem:[#allocation8] sm:$0xff]  ;;  %v140_v4 = vmul.f32 %v51_v1, %v51_v1  ;;  %v420_v11 = vmov 1.0   ;;  %vm228_vm3 = vcmask 64512  }
  0x37   :  { %292 = vmatprep.subr.mxu0 %v418_v0  ;;  %294 = vmatprep.mubr.msk.f32.mxu0 %vm419_vm1, %v418_v0  ;;  %v243_v5 = vmul.f32 %v238_v3, %v238_v3  ;;  %v135_v6 = vmul.f32 %v50_v2, %v50_v2  ;;  %v239_v7 = vmul.f32 %v238_v3, %v50_v2  ;;  %v219_v18 = vshrl.u32 %v218_v16, 7  ;;  %s422_s2 = smov [#allocation9]  }
  0x38   :  { %293 = vmatpush3.xpose.msk.msra.mxu0 %vm58_vm2, %v51_v1  ;;  %298 = vmatpush3.xpose.msk.msra.mxu1 %vm58_vm2, %v140_v4  ;;  %v421_v29 = vmov 0   ;;  %v260_v43 = vand.u32 127, %v218_v16  ;;  %s274_s19 = sshll.u32 %s422_s2, 4  ;;  %vm266_vm4 = vcmask 57344   ;;  %s275_s19 = int_to_ptr.vmem [resolvable:$true] %s274_s19 }
  0x39   :  { %v244_v8 = vsel %vm58_vm2, %v243_v5, 0.0  ;;  %v136_v9 = vsel %vm58_vm2, %v135_v6, 0.0  ;;  %v240_v10 = vsel %vm58_vm2, %v239_v7, 0.0  ;;  %v220_v19 = vsub.s32 0, %v219_v18  ;;  %310 = vset.pattern.permute.xlu0 %v421_v29  ;;  %s387_s20 = scalar_lea.vmem %s275_s19, 16  ;;  %s391_s21 = scalar_lea.vmem %s275_s19, 32 }
  0x3a   :  { %245 = vadd.xlane.f32.xlu1 %v244_v8  ;;  %137 = vadd.xlane.f32.xlu0 %v136_v9  ;;  %v263_v44 = vsub.s32 %v260_v43, %v219_v18  ;;  %p388_p10 = scmp.ne.s32.totalorder %s275_s19, %s387_s20  ;;  %p392_p11 = scmp.lt.s32.totalorder %s275_s19, %s275_s19 }
  0x3b   :  { %295 = vmatmul.mubr.msk.f32.vlgmr.msra.gmra.mrb[0].mxu0 %vm58_vm2, %v50_v2  ;;  %300 = vmatmul.mubr.msk.f32.vlgmr.msra.gmra.mrb[0].mxu1 %vm58_vm2, %v420_v11  ;;  %p393_p12 = scmp.lt.s32.totalorder %s391_s21, %s387_s20 }
  0x3d   :  { %v227_v31 = vld [vmem:[#allocation2] sm:$0xff]  ;;  %p394_p13 = por %p393_p12, %p392_p11 }
  0x3e   :  { %241 = vadd.xlane.f32.xlu1 %v240_v10 }
  0x3f   :  { %p395_p0 = pnand %p394_p13, %p388_p10 }
  0xc7   :  { %v138_v12 = vpop.xlane.xlu0 %137  ;;  %v246_v30 = vpop.xlane.xlu1 %245 }
  0xc8   :  { %311 = vrsqrt.f32 %v138_v12 }
  0xcb   :  { %v242_v38 = vpop.xlane.xlu1 %241 }
  0xd2   :  { %v312_v20 = vpop.eup %311 }
 0x10e   :  { %v131_v13 = vpop.f32.mrb[0].mxu0  ;;  %v213_v15 = vpop.f32.mrb[0].mxu1 }
 0x10f   :  { %v296_v14 = vpop.f32.mrb[1].mxu0  ;;  %313 = vrsqrt.f32 %v213_v15  ;;  %v301_v17 = vpop.f32.mrb[1].mxu1 }
 0x119   :  { %v314_v21 = vpop.eup %313 }
 0x11a   :  { %v221_v22 = vrot.slane %v314_v21, %v220_v19 }
 0x11c   :  { %v222_v23 = vmul.f32 %v312_v20, %v221_v22 }
 0x11e   :  { %v223_v24 = vmin.f32 %v222_v23, 1e+08 }
 0x120   :  { %v224_v25 = vmul.f32 %v223_v24, %v131_v13 }
 0x122   :  { %v225_v26 = vmul.f32 1.442695, %v224_v25 }
 0x124   :  { %315 = vpow2.f32 %v225_v26 }
 0x125   :  { %317 = vrsqrt.f32 %v246_v30 }
 0x12e   :  { %v316_v27 = vpop.eup %315 }
 0x12f   :  { %v229_v28 = vsel %vm228_vm3, %v316_v27, 0.0  ;;  %v318_v35 = vpop.eup %317 }
 0x130   :  { %230 = vadd.xlane.f32.xlu0 %v229_v28  ;;  %v248_v36 = vmul.f32 %v318_v35, %v312_v20 }
 0x132   :  { %v249_v37 = vmin.f32 %v248_v36, 1e+08 }
 0x134   :  { %v250_v40 = vmul.f32 %v249_v37, %v242_v38 }
 0x1bd   :  { %v231_v32 = vpop.xlane.xlu0 %230 }
 0x1be   :  { %v232_v33 = vadd.f32 %v231_v32, %v227_v31 }
 0x1c0   :  { %234 = vst.msk [vmem:[#allocation2] sm:$0xff] %vm56_vm0, %v232_v33 }
 0x1c7   :  { %v251_v34 = vld [vmem:[#allocation2] sm:$0xff] }
 0x1c8   :  { %319 = vlog2.f32 %v251_v34 }
 0x1d2   :  { %v320_v39 = vpop.eup %319 }
 0x1d3   :  { %v253_v41 = vmul.f32 0.6931472, %v320_v39 }
 0x1d5   :  { %v254_v42 = vsub.f32 %v253_v41, %v250_v40 }
 0x1d7   :  { %257 = vperm.xlu0 %310, %v254_v42  }
 0x256   :  { %v258_v45 = vpop.permute.xlu0 %257 }
 0x257   :  { %v264_v46 = vrot.slane %v258_v45, %v263_v44 }
 0x259   :  { %267 = vst.msk [vmem:[#allocation9] sm:$0x1] %vm266_vm4, %v264_v46 }
 0x25a   :  { %398 = shalt.err (!%p395_p0)
}
 0x25b   :  { %s399_s24 = scalar_lea.hbm %s503_s3, 16 }
 0x25c   :  { %p400_p1 = scmp.ne.s32.totalorder %s503_s3, %s399_s24  ;;  %p403_p2 = scmp.lt.u32.totalorder %s399_s24, %s503_s3 }
 0x25e   :  { %p405_p3 = pnand %p403_p2, %p400_p1 }
 0x260   :  { %408 = shalt.err (!%p405_p3)
}
 0x261   :  { %277 = dma.vmem_to_hbm [thread:$0]  %s275_s19, 16, %s503_s3, [#allocation5]  }
 0x262   :  { %413 = dma.done.wait [#allocation5], 16  }
 0x263   :  { %414 = vsyncadd [#allocation5], 4294967280 }
 0x264   :  { %281 = vsyncpa [#allocation4], 1 }
 0x265   :  { %282 = vsyncpa [#allocation7], 1 }
 0x266   :  { %283 = vsyncpa [#allocation5], 1 }

</bundles_post_ra>
